<compile_context>
chip_gen: v7x
topology: tpu7x:2x2x1
jax: 0.10.0
libtpu: 0.0.40
codegen_flags: <defaults>
</compile_context>

<pallas_src>
import jax
import jax.numpy as jnp
from jax.experimental import pallas as pl
from jax.experimental.pallas import tpu as pltpu

C_PAD = 128        # lane-dense class/output padding
SUBLANE = 16       # batch-tile granularity (safe for bf16 sublane packing)
TILE_M_CAP = 2048  # v7x-safe cap on rows per grid step


def _round_up(x, m):
    return ((x + m - 1) // m) * m


def _cdiv(a, b):
    return -(-a // b)


def _choose_tile_m(batch):
    """Batch tile: multiple of SUBLANE, <= TILE_M_CAP, >= 2 grid steps when the batch
    is large (v7x megacore sharding), and low padding waste otherwise."""
    bp = _round_up(max(batch, 1), SUBLANE)
    if bp <= 256:
        return bp                        # tiny batch: single step; launch-bound anyway
    n_steps = max(2, _cdiv(bp, TILE_M_CAP))
    return _round_up(_cdiv(bp, n_steps), SUBLANE)


def _mlp_kernel(x_ref, w1_ref, b1_ref, w2_ref, b2_ref, o_ref):
    # fc1: bf16 operands -> f32 accumulator on the MXU
    h = jnp.dot(x_ref[...], w1_ref[...], preferred_element_type=jnp.float32)
    h = jnp.maximum(h + b1_ref[...], 0.0)          # bias + ReLU in f32
    # dropout: identity (eval/inference mode)
    # out: bf16 operands -> f32 accumulator, lane-dense 128-wide output
    y = jnp.dot(h.astype(jnp.bfloat16), w2_ref[...], preferred_element_type=jnp.float32)
    y = y + b2_ref[...]
    o_ref[...] = y.astype(o_ref.dtype)


def policy_network_forward(x, w1_t, b1, w2_t_pad, b2_pad, num_classes,
                           out_dtype=jnp.bfloat16):
    """x: [B, input_size] (bf16 preferred); w1_t: [input_size, 896] bf16; b1: [1, 896] f32;
    w2_t_pad: [896, 128] bf16 (zero-padded cols); b2_pad: [1, 128] f32.
    Returns [B, num_classes] in out_dtype."""
    if x.dtype != jnp.bfloat16:
        x = x.astype(jnp.bfloat16)       # producers should hand bf16 directly
    B, IN = x.shape
    H = w1_t.shape[1]
    CP = w2_t_pad.shape[1]

    TILE_M = _choose_tile_m(B)
    Bp = _round_up(B, TILE_M)
    if Bp != B:
        x = jnp.pad(x, ((0, Bp - B), (0, 0)))
    grid = (Bp // TILE_M,)

    out = pl.pallas_call(
        _mlp_kernel,
        out_shape=jax.ShapeDtypeStruct((Bp, CP), out_dtype),
        grid=grid,
        in_specs=[
            pl.BlockSpec((TILE_M, IN), lambda i: (i, 0)),   # activation stream
            pl.BlockSpec((IN, H), lambda i: (0, 0)),        # VMEM-resident weights
            pl.BlockSpec((1, H), lambda i: (0, 0)),
            pl.BlockSpec((H, CP), lambda i: (0, 0)),
            pl.BlockSpec((1, CP), lambda i: (0, 0)),
        ],
        out_specs=pl.BlockSpec((TILE_M, CP), lambda i: (i, 0)),
        compiler_params=pltpu.CompilerParams(
            dimension_semantics=("parallel",),
        ),
    )(x, w1_t, b1, w2_t_pad, b2_pad)

    return out[:B, :num_classes]


def init_params(key, input_size, hidden, num_classes):
    """nn.Linear-style init: U(-1/sqrt(fan_in), 1/sqrt(fan_in)).
    Weights stored transposed [in, out], bf16; class dim padded to C_PAD lanes."""
    k1, k2, k3, k4 = jax.random.split(key, 4)
    bound1 = 1.0 / jnp.sqrt(jnp.float32(input_size))
    bound2 = 1.0 / jnp.sqrt(jnp.float32(hidden))
    w1_t = jax.random.uniform(k1, (input_size, hidden), jnp.float32, -bound1, bound1)
    b1 = jax.random.uniform(k2, (1, hidden), jnp.float32, -bound1, bound1)
    w2_t = jax.random.uniform(k3, (hidden, num_classes), jnp.float32, -bound2, bound2)
    b2 = jax.random.uniform(k4, (1, num_classes), jnp.float32, -bound2, bound2)
    # lane-pad output/class dim to 128
    w2_t_pad = jnp.zeros((hidden, C_PAD), jnp.float32).at[:, :num_classes].set(w2_t)
    b2_pad = jnp.zeros((1, C_PAD), jnp.float32).at[:, :num_classes].set(b2)
    return w1_t.astype(jnp.bfloat16), b1, w2_t_pad.astype(jnp.bfloat16), b2_pad


if __name__ == "__main__":
    B = 8            # batch
    INPUT_SIZE = 32  # input features
    HIDDEN = 896     # from module definition
    NUM_CLASSES = 10

    key = jax.random.PRNGKey(0)
    kx, kp = jax.random.split(key)
    x = jax.random.normal(kx, (B, INPUT_SIZE), jnp.float32).astype(jnp.bfloat16)
    w1_t, b1, w2_t_pad, b2_pad = init_params(kp, INPUT_SIZE, HIDDEN, NUM_CLASSES)

    out = policy_network_forward(x, w1_t, b1, w2_t_pad, b2_pad, NUM_CLASSES)
    out = jax.block_until_ready(out)

    # Reference with identical numerics (bf16 operands, f32 accumulation, eval dropout).
    h_ref = jnp.dot(x, w1_t, preferred_element_type=jnp.float32) + b1
    h_ref = jnp.maximum(h_ref, 0.0)
    ref = jnp.dot(h_ref.astype(jnp.bfloat16), w2_t_pad,
                  preferred_element_type=jnp.float32) + b2_pad
    ref = ref[:, :NUM_CLASSES].astype(jnp.bfloat16)

    assert out.shape == (B, NUM_CLASSES)
    assert out.dtype == jnp.bfloat16
    assert jnp.allclose(out.astype(jnp.float32), ref.astype(jnp.float32),
                        atol=5e-2, rtol=5e-2)

    print("KERNEL_OK")
</pallas_src>

<mosaic_0001>
module attributes {stable_mosaic.version = 11 : i64} {
  func.func @_mlp_kernel(%arg0: i32, %arg1: memref<16x32xbf16, #tpu.memory_space<vmem>>, %arg2: memref<32x896xbf16, #tpu.memory_space<vmem>>, %arg3: memref<1x896xf32, #tpu.memory_space<vmem>>, %arg4: memref<896x128xbf16, #tpu.memory_space<vmem>>, %arg5: memref<1x128xf32, #tpu.memory_space<vmem>>, %arg6: memref<16x128xbf16, #tpu.memory_space<vmem>>) attributes {dimension_semantics = [#tpu.dimension_semantics<parallel>], iteration_bounds = array<i64: 1>, scalar_prefetch = 0 : i64, scratch_operands = 0 : i64, tpu.core_type = #tpu.core_type<tc>, window_params = [{transform_indices = @transform_0, window_bounds = array<i64: 16, 32>}, {pipeline_mode = #tpu.pipeline_mode<synchronous>, transform_indices = @transform_1, window_bounds = array<i64: 32, 896>}, {pipeline_mode = #tpu.pipeline_mode<synchronous>, transform_indices = @transform_2, window_bounds = array<i64: 1, 896>}, {pipeline_mode = #tpu.pipeline_mode<synchronous>, transform_indices = @transform_3, window_bounds = array<i64: 896, 128>}, {pipeline_mode = #tpu.pipeline_mode<synchronous>, transform_indices = @transform_4, window_bounds = array<i64: 1, 128>}, {transform_indices = @transform_5, window_bounds = array<i64: 16, 128>}]} {
    %c0 = arith.constant 0 : index
    %c0_0 = arith.constant 0 : index
    %0 = vector.load %arg1[%c0, %c0_0] : memref<16x32xbf16, #tpu.memory_space<vmem>>, vector<16x32xbf16>
    %c0_1 = arith.constant 0 : index
    %c0_2 = arith.constant 0 : index
    %1 = vector.load %arg2[%c0_1, %c0_2] : memref<32x896xbf16, #tpu.memory_space<vmem>>, vector<32x896xbf16>
    %cst = arith.constant dense<0.000000e+00> : vector<16x896xf32>
    %2 = tpu.matmul %0, %1, %cst {dimension_numbers = #tpu.dot_dimension_numbers<[1], [0], [0], [1], [0, 0, 1, 1], [], []>} : vector<16x32xbf16>, vector<32x896xbf16>, vector<16x896xf32> -> vector<16x896xf32>
    %c0_3 = arith.constant 0 : index
    %c0_4 = arith.constant 0 : index
    %3 = vector.load %arg3[%c0_3, %c0_4] : memref<1x896xf32, #tpu.memory_space<vmem>>, vector<1x896xf32>
    %4 = vector.broadcast %3 : vector<1x896xf32> to vector<16x896xf32>
    %5 = arith.addf %2, %4 : vector<16x896xf32>
    %cst_5 = arith.constant 0.000000e+00 : f32
    %6 = vector.broadcast %cst_5 : f32 to vector<16x896xf32>
    %7 = arith.maximumf %5, %6 : vector<16x896xf32>
    %8 = arith.truncf %7 : vector<16x896xf32> to vector<16x896xbf16>
    %c0_6 = arith.constant 0 : index
    %c0_7 = arith.constant 0 : index
    %9 = vector.load %arg4[%c0_6, %c0_7] : memref<896x128xbf16, #tpu.memory_space<vmem>>, vector<896x128xbf16>
    %cst_8 = arith.constant dense<0.000000e+00> : vector<16x128xf32>
    %10 = tpu.matmul %8, %9, %cst_8 {dimension_numbers = #tpu.dot_dimension_numbers<[1], [0], [0], [1], [0, 0, 1, 1], [], []>} : vector<16x896xbf16>, vector<896x128xbf16>, vector<16x128xf32> -> vector<16x128xf32>
    %c0_9 = arith.constant 0 : index
    %c0_10 = arith.constant 0 : index
    %11 = vector.load %arg5[%c0_9, %c0_10] : memref<1x128xf32, #tpu.memory_space<vmem>>, vector<1x128xf32>
    %12 = vector.broadcast %11 : vector<1x128xf32> to vector<16x128xf32>
    %13 = arith.addf %10, %12 : vector<16x128xf32>
    %14 = arith.truncf %13 : vector<16x128xf32> to vector<16x128xbf16>
    %c0_11 = arith.constant 0 : index
    %c0_12 = arith.constant 0 : index
    %15 = vector.load %arg6[%c0_11, %c0_12] : memref<16x128xbf16, #tpu.memory_space<vmem>>, vector<16x128xbf16>
    tpu.vector_store %arg6[%c0_11, %c0_12], %14 {strides = array<i32>} : memref<16x128xbf16, #tpu.memory_space<vmem>>, vector<16x128xbf16>,
    return
  }
  func.func @transform_0(%arg0: i32) -> (i32, i32) {
    %c0_i32 = arith.constant 0 : i32
    %c0_i32_0 = arith.constant 0 : i32
    return %arg0, %c0_i32 : i32, i32
  }
  func.func @transform_1(%arg0: i32) -> (i32, i32) {
    %c0_i32 = arith.constant 0 : i32
    %c0_i32_0 = arith.constant 0 : i32
    %c0_i32_1 = arith.constant 0 : i32
    return %c0_i32, %c0_i32_0 : i32, i32
  }
  func.func @transform_2(%arg0: i32) -> (i32, i32) {
    %c0_i32 = arith.constant 0 : i32
    %c0_i32_0 = arith.constant 0 : i32
    %c0_i32_1 = arith.constant 0 : i32
    return %c0_i32, %c0_i32_0 : i32, i32
  }
  func.func @transform_3(%arg0: i32) -> (i32, i32) {
    %c0_i32 = arith.constant 0 : i32
    %c0_i32_0 = arith.constant 0 : i32
    %c0_i32_1 = arith.constant 0 : i32
    return %c0_i32, %c0_i32_0 : i32, i32
  }
  func.func @transform_4(%arg0: i32) -> (i32, i32) {
    %c0_i32 = arith.constant 0 : i32
    %c0_i32_0 = arith.constant 0 : i32
    %c0_i32_1 = arith.constant 0 : i32
    return %c0_i32, %c0_i32_0 : i32, i32
  }
  func.func @transform_5(%arg0: i32) -> (i32, i32) {
    %c0_i32 = arith.constant 0 : i32
    %c0_i32_0 = arith.constant 0 : i32
    return %arg0, %c0_i32 : i32, i32
  }
}

</mosaic_0001>

<bundles_post_ra>
// kernel: tpu_custom_call.1
= control target key start
LH: loop header
LB: loop body
LE: loop exit
PB: predicated region body
PF: predicated region fallthrough
CT: control target
= control target key end

     0   :  { %10 = vsyncpa [#allocation3], 0  ;;  %s1532_s0 = inlined_call_operand.hbm [shape: bf16[16,32], index: 0, kind: input, shape index: {}]   ;;  %s1533_s1 = inlined_call_operand.hbm [shape: bf16[32,896], index: 1, kind: input, shape index: {}]   ;;  %s1534_s2 = inlined_call_operand.vmem [shape: f32[1,896], index: 2, kind: input, shape index: {}]   ;;  %s1535_s3 = inlined_call_operand.hbm [shape: bf16[896,128], index: 3, kind: input, shape index: {}]   ;;  %s1536_s4 = inlined_call_operand.vmem [shape: f32[1,128], index: 4, kind: input, shape index: {}]   ;;  %s1537_s5 = inlined_call_operand.hbm [shape: bf16[16,128], index: 5, kind: output, shape index: {}]  }
   0x1   :  { %11 = vsyncpa [#allocation6], 0 }
   0x2   :  { %12 = vsyncpa [#allocation4], 0  ;;  %s1410_s18 = smov [#allocation5]   ;;  %s1316_s22 = scalar_lea.hbm %s1533_s1, 1792 }
   0x3   :  { %s30_s19 = sshll.u32 %s1410_s18, 4  ;;  %p1317_p0 = scmp.ne.s32.totalorder %s1533_s1, %s1316_s22  ;;  %s31_s19 = int_to_ptr.vmem [resolvable:$true] %s30_s19 }
   0x4   :  { %p1320_p1 = scmp.lt.u32.totalorder %s1316_s22, %s1533_s1 }
   0x6   :  { %p1322_p2 = pnand %p1320_p1, %p1317_p0 }
   0x8   :  { %1325 = shalt.err (!%p1322_p2)
}
   0x9   :  { %s1326_s27 = scalar_lea.vmem %s31_s19, 1792  ;;  %p1331_p4 = scmp.lt.s32.totalorder %s31_s19, %s31_s19 }
   0xa   :  { %p1327_p3 = scmp.ne.s32.totalorder %s31_s19, %s1326_s27  ;;  %p1332_p5 = scmp.lt.s32.totalorder %s1326_s27, %s1326_s27 }
   0xc   :  { %p1333_p6 = por %p1332_p5, %p1331_p4 }
   0xe   :  { %p1334_p7 = pnand %p1333_p6, %p1327_p3 }
  0x10   :  { %1337 = shalt.err (!%p1334_p7)
}
  0x11   :  { %s1411_s28 = smov 448   ;;  %s1412_s29 = smov 28  }
  0x12   :  { %36 = dma.hbm_to_vmem [thread:$0]  %s1533_s1, 1792, %s31_s19, [#allocation6], %s1411_s28, %s1411_s28, %s1412_s29  }
  0x13   :  { %s1413_s7 = smov [#allocation2]   ;;  %s1338_s11 = scalar_lea.hbm %s1532_s0, 128 }
  0x14   :  { %s18_s8 = sshll.u32 %s1413_s7, 4  ;;  %p1339_p8 = scmp.ne.s32.totalorder %s1532_s0, %s1338_s11  ;;  %s19_s8 = int_to_ptr.vmem [resolvable:$true] %s18_s8 }
  0x15   :  { %p1342_p9 = scmp.lt.u32.totalorder %s1338_s11, %s1532_s0 }
  0x17   :  { %p1344_p10 = pnand %p1342_p9, %p1339_p8 }
  0x19   :  { %1347 = shalt.err (!%p1344_p10)
}
  0x1a   :  { %s1348_s16 = scalar_lea.vmem %s19_s8, 128  ;;  %p1353_p12 = scmp.lt.s32.totalorder %s19_s8, %s19_s8 }
  0x1b   :  { %p1349_p11 = scmp.ne.s32.totalorder %s19_s8, %s1348_s16  ;;  %p1354_p13 = scmp.lt.s32.totalorder %s1348_s16, %s1348_s16 }
  0x1d   :  { %p1355_p0 = por %p1354_p13, %p1353_p12 }
  0x1f   :  { %p1356_p1 = pnand %p1355_p0, %p1349_p11 }
  0x21   :  { %1359 = shalt.err (!%p1356_p1)
}
  0x22   :  { %s1414_s1 = smov 64   ;;  %s1415_s17 = smov 4  }
  0x23   :  { %24 = dma.hbm_to_vmem [thread:$0]  %s1532_s0, 128, %s19_s8, [#allocation3], %s1414_s1, %s1414_s1, %s1415_s17  }
  0x24   :  { %s1416_s20 = smov [#allocation7]   ;;  %s1360_s24 = scalar_lea.hbm %s1535_s3, 7168 }
  0x25   :  { %s44_s21 = sshll.u32 %s1416_s20, 4  ;;  %p1361_p2 = scmp.ne.s32.totalorder %s1535_s3, %s1360_s24  ;;  %s45_s21 = int_to_ptr.vmem [resolvable:$true] %s44_s21 }
  0x26   :  { %p1364_p3 = scmp.lt.u32.totalorder %s1360_s24, %s1535_s3 }
  0x28   :  { %p1366_p4 = pnand %p1364_p3, %p1361_p2 }
  0x2a   :  { %1369 = shalt.err (!%p1366_p4)
}
  0x2b   :  { %s1370_s29 = scalar_lea.vmem %s45_s21, 7168  ;;  %p1375_p6 = scmp.lt.s32.totalorder %s45_s21, %s45_s21 }
  0x2c   :  { %p1371_p5 = scmp.ne.s32.totalorder %s45_s21, %s1370_s29  ;;  %p1376_p7 = scmp.lt.s32.totalorder %s1370_s29, %s1370_s29 }
  0x2e   :  { %p1377_p8 = por %p1376_p7, %p1375_p6 }
  0x30   :  { %p1378_p9 = pnand %p1377_p8, %p1371_p5 }
  0x32   :  { %1381 = shalt.err (!%p1378_p9)
}
  0x33   :  { %50 = dma.hbm_to_vmem [thread:$0]  %s1535_s3, 7168, %s45_s21, [#allocation6], %s1414_s1, %s1414_s1, %s1415_s17  }
  0x34   :  { %1404 = dma.done.wait [#allocation3], 128  }
  0x35   :  { %1405 = vsyncadd [#allocation3], 4294967168 }
  0x36   :  { %1406 = dma.done.wait [#allocation6], 8960  }
  0x37   :  { %1407 = vsyncadd [#allocation6], 4294958336  ;;  %v1417_v0 = vmov 0   ;;  %v1239_v1 = vld [vmem:[#allocation5 + $0x4] ss:$28 sps:$4 sm:$0xff]   ;;  %v1251_v9 = vld [vmem:[#allocation2] sm:$0xff]   ;;  %v83_v50 = vlaneseq }
  0x38   :  { %231 = vmatprep.mubr.bf16.mxu0 %v1417_v0  ;;  %274 = vmatprep.mubr.bf16.mxu1 %v1417_v0  ;;  %v1241_v2 = vld [vmem:[#allocation5 + $0xc] ss:$28 sps:$4 sm:$0xff]   ;;  %v1243_v3 = vld [vmem:[#allocation5] ss:$28 sps:$4 sm:$0xff]   ;;  %v1249_v7 = vld [vmem:[#allocation5 + $0x38] ss:$28 sps:$4 sm:$0xff]  }
  0x39   :  { %199 = vmatprep.subr.bf16.mxu0 %v1239_v1  ;;  %v1244_v4 = vld [vmem:[#allocation5 + $0x8] ss:$28 sps:$4 sm:$0xff]   ;;  %242 = vmatprep.subr.bf16.mxu1 %v1241_v2  ;;  %v1245_v5 = vld [vmem:[#allocation5 + $0x3c] ss:$28 sps:$4 sm:$0xff]   ;;  %vm195_vm0 = vcmask 261120   ;;  %v1418_v13 = vmov 0.0  }
  0x3a   :  { %200 = vmatpush1.bf16.msra.mxu0 %v1243_v3  ;;  %243 = vmatpush1.bf16.msra.mxu1 %v1244_v4  ;;  %v1247_v6 = vld [vmem:[#allocation5 + $0x44] ss:$28 sps:$4 sm:$0xff]   ;;  %v1254_v10 = vld [vmem:[#allocation5 + $0x14] ss:$28 sps:$4 sm:$0xff]   ;;  %v1257_v12 = vld [vmem:[#allocation5 + $0x4c] ss:$28 sps:$4 sm:$0xff]  }
  0x3b   :  { %201 = vmatprep.subr.bf16.mxu0 %v1245_v5  ;;  %v1250_v8 = vld [vmem:[#allocation5 + $0x40] ss:$28 sps:$4 sm:$0xff]   ;;  %244 = vmatprep.subr.bf16.mxu1 %v1247_v6  ;;  %v1252_v11 = vld [vmem:[#allocation5 + $0x10] ss:$28 sps:$4 sm:$0xff]   ;;  %v1258_v14 = vld [vmem:[#allocation5 + $0x18] ss:$28 sps:$4 sm:$0xff]  }
  0x3c   :  { %v1255_v15 = vld [vmem:[#allocation5 + $0x48] ss:$28 sps:$4 sm:$0xff]   ;;  %v1259_v16 = vld [vmem:[#allocation5 + $0x50] ss:$28 sps:$4 sm:$0xff]   ;;  %vm1419_vm1 = vmmov 0   ;;  %v1264_v21 = vld [vmem:[#allocation7 + $0x48] sm:$0xff]  }
  0x3d   :  { %v1260_v17 = vld [vmem:[#allocation7 + $0x40] sm:$0xff]   ;;  %v1265_v22 = vld [vmem:[#allocation7 + $0xc8] sm:$0xff]   ;;  %v1268_v25 = vld [vmem:[#allocation7 + $0x50] sm:$0xff]   ;;  %v84_v51 = vshrl.u32 %v83_v50, 7 }
  0x3e   :  { %202 = vmatpush1.bf16.msra.mxu0 %v1249_v7  ;;  %245 = vmatpush1.bf16.msra.mxu1 %v1250_v8  ;;  %v1261_v18 = vld [vmem:[#allocation7 + $0xc0] sm:$0xff]   ;;  %v1266_v23 = vld [vmem:[#allocation7 + $0x8] sm:$0xff]   ;;  %v1269_v26 = vld [vmem:[#allocation7 + $0xd0] sm:$0xff]  }
  0x3f   :  { %285 = vmatprep.subr.bf16.mxu0 %v1254_v10  ;;  %1200 = vmatprep.subr.bf16.mxu1 %v1418_v13  ;;  %v1262_v19 = vld [vmem:[#allocation7] sm:$0xff]   ;;  %v1267_v24 = vld [vmem:[#allocation7 + $0x88] sm:$0xff]   ;;  %v1270_v27 = vld [vmem:[#allocation7 + $0x10] sm:$0xff]   ;;  %v85_v52 = vsub.s32 0, %v84_v51  ;;  %v93_v53 = vsub.s32 2, %v84_v51  ;;  %v89_v55 = vsub.s32 1, %v84_v51 }
  0x40   :  { %v1263_v20 = vld [vmem:[#allocation7 + $0x80] sm:$0xff]   ;;  %v1271_v28 = vld [vmem:[#allocation7 + $0x90] sm:$0xff]   ;;  %v1272_v29 = vld [vmem:[#allocation7 + $0x58] sm:$0xff]   ;;  %v97_v56 = vsub.s32 3, %v84_v51  ;;  %v101_v63 = vsub.s32 4, %v84_v51  ;;  %v109_v4 = vsub.s32 6, %v84_v51 }
  0x41   :  { %1052 = vmatmul.mubr.msk.bf16.vlgmr.msra.gmra.mrb[0].mxu0 %vm195_vm0, %v1251_v9  ;;  %1053 = vmatmul.mubr.msk.bf16.vlgmr.msra.gmra.mrb[0].mxu1 %vm195_vm0, %v1251_v9  ;;  %v1273_v30 = vld [vmem:[#allocation7 + $0xd8] sm:$0xff]   ;;  %v1276_v33 = vld [vmem:[#allocation7 + $0x60] sm:$0xff]   ;;  %v1280_v37 = vld [vmem:[#allocation7 + $0x68] sm:$0xff]  }
  0x42   :  { %286 = vmatpush1.bf16.msra.mxu0 %v1252_v11  ;;  %1201 = vmatpush3.bf16.msra.mxu1 %v1258_v14  ;;  %v1274_v31 = vld [vmem:[#allocation7 + $0x18] sm:$0xff]   ;;  %v1277_v34 = vld [vmem:[#allocation7 + $0xe0] sm:$0xff]   ;;  %v1281_v38 = vld [vmem:[#allocation7 + $0xe8] sm:$0xff]  }
  0x43   :  { %287 = vmatprep.subr.bf16.mxu0 %v1257_v12  ;;  %317 = vmatprep.mubr.bf16.mxu0 %v1417_v0  ;;  %v1275_v32 = vld [vmem:[#allocation7 + $0x98] sm:$0xff]   ;;  %v1278_v35 = vld [vmem:[#allocation7 + $0x20] sm:$0xff]   ;;  %v1282_v39 = vld [vmem:[#allocation7 + $0x28] sm:$0xff]  }
  0x44   :  { %1202 = vmatprep.subr.bf16.mxu1 %v1418_v13  ;;  %1204 = vmatprep.mubr.msk.bf16.mxu1 %vm1419_vm1, %v1418_v13  ;;  %v1279_v36 = vld [vmem:[#allocation7 + $0xa0] sm:$0xff]   ;;  %v1283_v40 = vld [vmem:[#allocation7 + $0xa8] sm:$0xff]   ;;  %v1284_v41 = vld [vmem:[#allocation7 + $0x70] sm:$0xff]  }
  0x45   :  { %v1285_v42 = vld [vmem:[#allocation7 + $0xf0] sm:$0xff]   ;;  %v1288_v45 = vld [vmem:[#allocation7 + $0x78] sm:$0xff]   ;;  %v1292_v49 = vld [vmem:[#allocation7 + $0x140] sm:$0xff]  }
  0x46   :  { %288 = vmatpush1.bf16.msra.mxu0 %v1255_v15  ;;  %1203 = vmatpush3.bf16.msra.mxu1 %v1259_v16  ;;  %v1286_v43 = vld [vmem:[#allocation7 + $0x30] sm:$0xff]   ;;  %v1289_v46 = vld [vmem:[#allocation7 + $0xf8] sm:$0xff]   ;;  %v81_v54 = vld [vmem:[%s1534_s2] sm:$0xff] }
  0x47   :  { %1125 = vmatprep.subr.bf16.mxu0 %v1260_v17  ;;  %1147 = vmatprep.subr.bf16.mxu1 %v1261_v18  ;;  %v1287_v44 = vld [vmem:[#allocation7 + $0xb0] sm:$0xff]   ;;  %v1290_v47 = vld [vmem:[#allocation7 + $0x38] sm:$0xff]   ;;  %v86_v57 = vrot.slane %v81_v54, %v85_v52  ;;  %v94_v58 = vrot.slane %v81_v54, %v93_v53  ;;  %v90_v59 = vrot.slane %v81_v54, %v89_v55  ;;  %v1296_v50 = vld [vmem:[#allocation7 + $0x108] sm:$0xff]  }
  0x48   :  { %v1291_v48 = vld [vmem:[#allocation7 + $0xb8] sm:$0xff]   ;;  %v98_v60 = vrot.slane %v81_v54, %v97_v56 }
  0x49   :  { %1054 = vmatmul.mubr.msk.bf16.vlgmr.msra.gmra.mrb[4].mxu0 %vm195_vm0, %v1251_v9  ;;  %1205 = vmatmul.mubr.msk.bf16.vlgmr.msra.gmra.mrb[4].mxu1 %vm195_vm0, %v1251_v9  ;;  %v105_v9 = vsub.s32 5, %v84_v51  ;;  %v1297_v51 = vld [vmem:[#allocation7 + $0x188] sm:$0xff]  }
  0x4a   :  { %1126 = vmatpush3.bf16.msra.mxu0 %v1262_v19  ;;  %1148 = vmatpush3.bf16.msra.mxu1 %v1263_v20  ;;  %v102_v19 = vrot.slane %v81_v54, %v101_v63  ;;  %v1301_v63 = vld [vmem:[#allocation7 + $0x158] sm:$0xff]  }
  0x4b   :  { %1127 = vmatprep.subr.bf16.mxu0 %v1264_v21  ;;  %1149 = vmatprep.subr.bf16.mxu1 %v1265_v22 }
  0x4e   :  { %1128 = vmatpush3.bf16.msra.mxu0 %v1266_v23  ;;  %1150 = vmatpush3.bf16.msra.mxu1 %v1267_v24  ;;  %v110_v23 = vrot.slane %v81_v54, %v109_v4  ;;  %v1306_v4 = vld [vmem:[#allocation7 + $0x1a0] sm:$0xff]  }
  0x4f   :  { %1129 = vmatprep.subr.bf16.mxu0 %v1268_v25  ;;  %1151 = vmatprep.subr.bf16.mxu1 %v1269_v26 }
  0x52   :  { %1130 = vmatpush3.bf16.msra.mxu0 %v1270_v27  ;;  %1152 = vmatpush3.bf16.msra.mxu1 %v1271_v28  ;;  %v106_v27 = vrot.slane %v81_v54, %v105_v9  ;;  %v1298_v54 = vld [vmem:[#allocation7 + $0x150] sm:$0xff]  }
  0x53   :  { %1131 = vmatprep.subr.bf16.mxu0 %v1272_v29  ;;  %1153 = vmatprep.subr.bf16.mxu1 %v1273_v30  ;;  %v1311_v9 = vld [vmem:[#allocation7 + $0x130] sm:$0xff]  }
  0x56   :  { %1132 = vmatpush3.bf16.msra.mxu0 %v1274_v31  ;;  %1154 = vmatpush3.bf16.msra.mxu1 %v1275_v32  ;;  %v1293_v32 = vld [vmem:[#allocation7 + $0x100] sm:$0xff]  }
  0x57   :  { %1133 = vmatprep.subr.bf16.mxu0 %v1276_v33  ;;  %1155 = vmatprep.subr.bf16.mxu1 %v1277_v34  ;;  %v1294_v33 = vld [vmem:[#allocation7 + $0x180] sm:$0xff]  }
  0x5a   :  { %1134 = vmatpush3.bf16.msra.mxu0 %v1278_v35  ;;  %1156 = vmatpush3.bf16.msra.mxu1 %v1279_v36  ;;  %v1295_v36 = vld [vmem:[#allocation7 + $0x148] sm:$0xff]  }
  0x5b   :  { %1135 = vmatprep.subr.bf16.mxu0 %v1280_v37  ;;  %1157 = vmatprep.subr.bf16.mxu1 %v1281_v38 }
  0x5e   :  { %1136 = vmatpush3.bf16.msra.mxu0 %v1282_v39  ;;  %1158 = vmatpush3.bf16.msra.mxu1 %v1283_v40 }
  0x5f   :  { %1137 = vmatprep.subr.bf16.mxu0 %v1284_v41  ;;  %1159 = vmatprep.subr.bf16.mxu1 %v1285_v42 }
  0x62   :  { %1138 = vmatpush3.bf16.msra.mxu0 %v1286_v43  ;;  %1160 = vmatpush3.bf16.msra.mxu1 %v1287_v44 }
  0x63   :  { %1139 = vmatprep.subr.bf16.mxu0 %v1288_v45  ;;  %1161 = vmatprep.subr.bf16.mxu1 %v1289_v46 }
  0x66   :  { %1140 = vmatpush3.bf16.msra.mxu0 %v1290_v47  ;;  %1162 = vmatpush3.bf16.msra.mxu1 %v1291_v48 }
  0x67   :  { %1208 = vmatprep.subr.bf16.mxu1 %v1418_v13  ;;  %1169 = vmatprep.subr.bf16.mxu0 %v1292_v49 }
 0x114   :  { %v233_v61 = vpop.f32.mrb[0].mxu0  ;;  %v276_v62 = vpop.f32.mrb[0].mxu1 }
 0x115   :  { %v234_v0 = vadd.f32 %v233_v61, %v86_v57  ;;  %v277_v1 = vadd.f32 %v276_v62, %v94_v58  ;;  %v235_v2 = vpop.f32.mrb[1].mxu0  ;;  %v278_v3 = vpop.f32.mrb[1].mxu1  ;;  %v1300_v61 = vld [vmem:[#allocation7 + $0x190] sm:$0xff]  }
 0x116   :  { %v236_v5 = vadd.f32 %v235_v2, %v90_v59  ;;  %v279_v6 = vadd.f32 %v278_v3, %v98_v60  ;;  %v237_v7 = vpop.f32.mrb[2].mxu0  ;;  %v280_v8 = vpop.f32.mrb[2].mxu1  ;;  %v1304_v2 = vld [vmem:[#allocation7 + $0x160] sm:$0xff]  }
 0x117   :  { %v371_v10 = vmax.f32 %v277_v1, 0.0  ;;  %v238_v11 = vadd.f32 %v237_v7, %v86_v57  ;;  %v281_v12 = vadd.f32 %v280_v8, %v94_v58  ;;  %v239_v14 = vpop.f32.mrb[3].mxu0  ;;  %v282_v15 = vpop.f32.mrb[3].mxu1  ;;  %v369_v20 = vmax.f32 %v234_v0, 0.0  ;;  %v1302_v0 = vld [vmem:[#allocation7 + $0x118] sm:$0xff]   ;;  %v1305_v3 = vld [vmem:[#allocation7 + $0x120] sm:$0xff]  }
 0x118   :  { %v372_v16 = vmax.f32 %v279_v6, 0.0  ;;  %v240_v17 = vadd.f32 %v239_v14, %v90_v59  ;;  %v283_v18 = vadd.f32 %v282_v15, %v98_v60  ;;  %v370_v24 = vmax.f32 %v236_v5, 0.0  ;;  %v1299_v60 = vld [vmem:[#allocation7 + $0x110] sm:$0xff]   ;;  %v1303_v1 = vld [vmem:[#allocation7 + $0x198] sm:$0xff]   ;;  %v1307_v5 = vld [vmem:[#allocation7 + $0x168] sm:$0xff]  }
 0x119   :  { %v376_v21 = vmax.f32 %v238_v11, 0.0  ;;  %v378_v22 = vmax.f32 %v281_v12, 0.0  ;;  %v1308_v6 = vld [vmem:[#allocation7 + $0x128] sm:$0xff]   ;;  %v1310_v8 = vld [vmem:[#allocation7 + $0x170] sm:$0xff]   ;;  %v1313_v11 = vld [vmem:[#allocation7 + $0x178] sm:$0xff]  }
 0x11a   :  { %v377_v25 = vmax.f32 %v240_v17, 0.0  ;;  %v379_v26 = vmax.f32 %v283_v18, 0.0  ;;  %v1309_v7 = vld [vmem:[#allocation7 + $0x1a8] sm:$0xff]   ;;  %v1314_v12 = vld [vmem:[#allocation7 + $0x138] sm:$0xff]  }
 0x11b   :  { %v383_v28 = vpack.c.bf16 %v376_v21, %v369_v20  ;;  %v385_v29 = vpack.c.bf16 %v378_v22, %v371_v10  ;;  %v1312_v10 = vld [vmem:[#allocation7 + $0x1b0] sm:$0xff]   ;;  %v1315_v14 = vld [vmem:[#allocation7 + $0x1b8] sm:$0xff]   ;;  %v1056_v17 = vld [vmem:[%s1536_s4] ss:$0 sm:$0xff]  ;;  %s1420_s4 = smov [#allocation8]  }
 0x11c   :  { %v384_v30 = vpack.c.bf16 %v377_v25, %v370_v24  ;;  %v386_v31 = vpack.c.bf16 %v379_v26, %v372_v16  ;;  %v319_v34 = vpop.f32.mrb[4].mxu0  ;;  %v362_v35 = vpop.f32.mrb[4].mxu1  ;;  %s1024_s8 = sshll.u32 %s1420_s4, 4  ;;  %s1025_s8 = int_to_ptr.vmem [resolvable:$true] %s1024_s8 }
 0x11d   :  { %v320_v37 = vadd.f32 %v319_v34, %v102_v19  ;;  %v321_v38 = vpop.f32.mrb[5].mxu0  ;;  %v363_v39 = vadd.f32 %v362_v35, %v110_v23  ;;  %v1206_v40 = vpop.f32.mrb[5].mxu1  ;;  %s1382_s9 = scalar_lea.vmem %s1025_s8, 128  ;;  %p1387_p11 = scmp.lt.s32.totalorder %s1025_s8, %s1025_s8 }
 0x11e   :  { %877 = vmatprep.mubr.bf16.mxu0 %v384_v30  ;;  %918 = vmatprep.mubr.bf16.mxu1 %v386_v31  ;;  %v322_v41 = vadd.f32 %v321_v38, %v106_v27  ;;  %v323_v42 = vpop.f32.mrb[6].mxu0  ;;  %v365_v43 = vpop.f32.mrb[6].mxu1  ;;  %p1383_p10 = scmp.ne.s32.totalorder %s1025_s8, %s1382_s9  ;;  %p1388_p12 = scmp.lt.s32.totalorder %s1382_s9, %s1382_s9 }
 0x11f   :  { %878 = vmatmul.mubr.bf16.vlgmr.msra.gmra.mrb[8].mxu0 %v383_v28  ;;  %919 = vmatmul.mubr.bf16.vlgmr.msra.gmra.mrb[8].mxu1 %v385_v29  ;;  %v373_v44 = vmax.f32 %v320_v37, 0.0  ;;  %v324_v45 = vadd.f32 %v323_v42, %v102_v19  ;;  %v325_v46 = vpop.f32.mrb[7].mxu0  ;;  %v375_v47 = vmax.f32 %v363_v39, 0.0  ;;  %v366_v48 = vadd.f32 %v365_v43, %v110_v23  ;;  %v1207_v49 = vpop.f32.mrb[7].mxu1 }
 0x120   :  { %1170 = vmatpush3.bf16.msra.mxu0 %v1293_v32  ;;  %1209 = vmatpush3.bf16.msra.mxu1 %v1294_v33  ;;  %v374_v52 = vmax.f32 %v322_v41, 0.0  ;;  %v326_v53 = vadd.f32 %v325_v46, %v106_v27  ;;  %p1389_p13 = por %p1388_p12, %p1387_p11 }
 0x121   :  { %1171 = vmatprep.subr.bf16.mxu0 %v1295_v36  ;;  %1210 = vmatprep.subr.bf16.mxu1 %v1418_v13  ;;  %v380_v55 = vmax.f32 %v324_v45, 0.0  ;;  %v382_v56 = vmax.f32 %v366_v48, 0.0 }
 0x122   :  { %v381_v57 = vmax.f32 %v326_v53, 0.0  ;;  %1224 = vmatprep.mubr.msk.bf16.mxu1 %vm1419_vm1, %v1418_v13  ;;  %p1390_p0 = pnand %p1389_p13, %p1383_p10 }
 0x123   :  { %v387_v58 = vpack.c.bf16 %v380_v55, %v373_v44  ;;  %v389_v59 = vpack.c.bf16 %v382_v56, %v375_v47 }
 0x124   :  { %1172 = vmatpush3.bf16.msra.mxu0 %v1296_v50  ;;  %1211 = vmatpush3.bf16.msra.mxu1 %v1297_v51  ;;  %v388_v62 = vpack.c.bf16 %v381_v57, %v374_v52 }
 0x125   :  { %1173 = vmatprep.subr.bf16.mxu0 %v1298_v54  ;;  %1212 = vmatprep.subr.bf16.mxu1 %v1418_v13 }
 0x126   :  { %959 = vmatprep.mubr.bf16.mxu0 %v388_v62 }
 0x128   :  { %1174 = vmatpush3.bf16.msra.mxu0 %v1299_v60  ;;  %1213 = vmatpush3.bf16.msra.mxu1 %v1300_v61 }
 0x129   :  { %1175 = vmatprep.subr.bf16.mxu0 %v1301_v63  ;;  %1214 = vmatprep.subr.bf16.mxu1 %v1418_v13 }
 0x12c   :  { %1176 = vmatpush3.bf16.msra.mxu0 %v1302_v0  ;;  %1215 = vmatpush3.bf16.msra.mxu1 %v1303_v1 }
 0x12d   :  { %1177 = vmatprep.subr.bf16.mxu0 %v1304_v2  ;;  %1216 = vmatprep.subr.bf16.mxu1 %v1418_v13 }
 0x130   :  { %1178 = vmatpush3.bf16.msra.mxu0 %v1305_v3  ;;  %1217 = vmatpush3.bf16.msra.mxu1 %v1306_v4 }
 0x131   :  { %1179 = vmatprep.subr.bf16.mxu0 %v1307_v5  ;;  %1218 = vmatprep.subr.bf16.mxu1 %v1418_v13 }
 0x134   :  { %1180 = vmatpush3.bf16.msra.mxu0 %v1308_v6  ;;  %1219 = vmatpush3.bf16.msra.mxu1 %v1309_v7 }
 0x135   :  { %1181 = vmatprep.subr.bf16.mxu0 %v1310_v8  ;;  %1220 = vmatprep.subr.bf16.mxu1 %v1418_v13 }
 0x138   :  { %1182 = vmatpush3.bf16.msra.mxu0 %v1311_v9  ;;  %1221 = vmatpush3.bf16.msra.mxu1 %v1312_v10 }
 0x139   :  { %1183 = vmatprep.subr.bf16.mxu0 %v1313_v11  ;;  %1222 = vmatprep.subr.bf16.mxu1 %v1418_v13 }
 0x13c   :  { %1184 = vmatpush3.bf16.msra.mxu0 %v1314_v12  ;;  %1223 = vmatpush3.bf16.msra.mxu1 %v1315_v14 }
 0x13f   :  { %960 = vmatmul.mubr.bf16.vlgmr.msra.gmra.mrb[12].mxu0 %v387_v58  ;;  %1225 = vmatmul.mubr.bf16.vlgmr.msra.gmra.mrb[12].mxu1 %v389_v59 }
 0x1f2   :  { %v1141_v15 = vpop.f32.mrb[8].mxu0  ;;  %v1163_v16 = vpop.f32.mrb[8].mxu1 }
 0x1f3   :  { %v1142_v18 = vpop.f32.mrb[9].mxu0  ;;  %v1164_v19 = vpop.f32.mrb[9].mxu1 }
 0x1f4   :  { %v1143_v20 = vadd.f32 %v1142_v18, %v1141_v15  ;;  %v1165_v21 = vadd.f32 %v1164_v19, %v1163_v16  ;;  %v1144_v22 = vpop.f32.mrb[10].mxu0  ;;  %v1166_v23 = vpop.f32.mrb[10].mxu1 }
 0x1f5   :  { %v1145_v24 = vpop.f32.mrb[11].mxu0  ;;  %v1167_v25 = vpop.f32.mrb[11].mxu1 }
 0x1f6   :  { %v880_v26 = vadd.f32 %v1143_v20, %v1056_v17  ;;  %v1146_v13 = vadd.f32 %v1145_v24, %v1144_v22  ;;  %v1168_v27 = vadd.f32 %v1167_v25, %v1166_v23 }
 0x1f8   :  { %v921_v28 = vadd.f32 %v1165_v21, %v880_v26  ;;  %v883_v29 = vadd.f32 %v1146_v13, %v1056_v17 }
 0x1fa   :  { %v924_v30 = vadd.f32 %v1168_v27, %v883_v29 }
 0x212   :  { %v1185_v31 = vpop.f32.mrb[12].mxu0  ;;  %v1002_v32 = vpop.f32.mrb[12].mxu1 }
 0x213   :  { %v1186_v33 = vpop.f32.mrb[13].mxu0  ;;  %v1226_v34 = vpop.f32.mrb[13].mxu1 }
 0x214   :  { %v1187_v35 = vadd.f32 %v1186_v33, %v1185_v31  ;;  %v1188_v36 = vpop.f32.mrb[14].mxu0  ;;  %v1005_v37 = vpop.f32.mrb[14].mxu1 }
 0x215   :  { %v1189_v38 = vpop.f32.mrb[15].mxu0  ;;  %v1227_v39 = vpop.f32.mrb[15].mxu1 }
 0x216   :  { %v962_v40 = vadd.f32 %v1187_v35, %v921_v28  ;;  %v1190_v41 = vadd.f32 %v1189_v38, %v1188_v36 }
 0x218   :  { %v1003_v42 = vadd.f32 %v1002_v32, %v962_v40  ;;  %v965_v43 = vadd.f32 %v1190_v41, %v924_v30 }
 0x21a   :  { %v1006_v44 = vadd.f32 %v1005_v37, %v965_v43 }
 0x21c   :  { %v1120_v45 = vpack.c.bf16 %v1006_v44, %v1003_v42 }
 0x21e   :  { %1121 = vst [vmem:[#allocation8] sm:$0xff] %v1120_v45  }
 0x21f   :  { %1393 = shalt.err (!%p1390_p0)
}
 0x220   :  { %s1394_s12 = scalar_lea.hbm %s1537_s5, 128 }
 0x221   :  { %p1395_p1 = scmp.ne.s32.totalorder %s1537_s5, %s1394_s12  ;;  %p1398_p2 = scmp.lt.u32.totalorder %s1394_s12, %s1537_s5 }
 0x223   :  { %p1400_p3 = pnand %p1398_p2, %p1395_p1 }
 0x225   :  { %1403 = shalt.err (!%p1400_p3)
}
 0x226   :  { %1030 = dma.vmem_to_hbm [thread:$0]  %s1025_s8, 128, %s1537_s5, [#allocation4], %s1414_s1, %s1414_s1, %s1415_s17  }
 0x227   :  { %1408 = dma.done.wait [#allocation4], 128  }
 0x228   :  { %1409 = vsyncadd [#allocation4], 4294967168 }
 0x229   :  { %1034 = vsyncpa [#allocation3], 1 }
 0x22a   :  { %1035 = vsyncpa [#allocation6], 1 }
 0x22b   :  { %1036 = vsyncpa [#allocation4], 1 }

</bundles_post_ra>
